<compile_context>
chip_gen: v7x
topology: tpu7x:2x2x1
jax: 0.10.0
libtpu: 0.0.40
codegen_flags: <defaults>
</compile_context>

<pallas_src>
import math

import jax
import jax.numpy as jnp
from jax.experimental import pallas as pl
from jax.experimental.pallas import tpu as pltpu

_SMALL_VMEM_BUDGET = 12 * 1024 * 1024   # stay under v5e's 16 MiB scoped default
_TILED_VMEM_BUDGET = 40 * 1024 * 1024   # v7x-safe (64 MiB physical) with headroom


# --------------------------------------------------------------------------
# Kernels
# --------------------------------------------------------------------------
def _gc_small_kernel(adj_ref, nodes_ref, w_ref, out_ref):
    # adj_ref:   (W, N, N)       one batch element, all windows (batch squeezed)
    # nodes_ref: (W, N, Fin)
    # w_ref:     (W, Fin, Fout)  full weight tensor, resident
    # out_ref:   (W, N, Fout)
    xw = jnp.einsum("wnf,wfo->wno", nodes_ref[...], w_ref[...],
                    preferred_element_type=jnp.float32)          # (W, N, Fout)
    y = jnp.einsum("wij,wjo->wio", adj_ref[...], xw,
                   preferred_element_type=jnp.float32)           # (W, N, Fout)
    out_ref[...] = y.astype(out_ref.dtype)


def _gc_tiled_kernel(adj_ref, nodes_ref, w_ref, out_ref):
    # adj_ref:   (B, TILE_N, N)  window dim squeezed by the BlockSpec
    # nodes_ref: (B, N, Fin)
    # w_ref:     (Fin, Fout)
    # out_ref:   (B, TILE_N, Fout)
    xw = jnp.einsum("bnf,fo->bno", nodes_ref[...], w_ref[...],
                    preferred_element_type=jnp.float32)          # (B, N, Fout)
    y = jnp.einsum("bij,bjo->bio", adj_ref[...], xw,
                   preferred_element_type=jnp.float32)           # (B, TILE_N, Fout)
    out_ref[...] = y.astype(out_ref.dtype)


# --------------------------------------------------------------------------
# Wrapper
# --------------------------------------------------------------------------
def _choose_row_tile(B, N, Fin, Fout, itemsize, budget):
    """Largest TILE_N (multiple of 8, <= N) whose working set fits `budget`."""
    # Resident per step: nodes + weights (double-buffered) + f32 xw intermediate.
    fixed = 2 * itemsize * (B * N * Fin + Fin * Fout) + 4 * B * N * Fout
    # Per output row: adjacency stripe + output (double-buffered) + f32 y rows.
    per_row = 2 * itemsize * B * N + 2 * itemsize * B * Fout + 4 * B * Fout
    if fixed + per_row * N <= budget:
        return N
    max_rows = max(8, (budget - fixed) // max(per_row, 1))
    return int(max(8, min(N, (max_rows // 8) * 8)))


def graph_convolution(adjacency, nodes, weights):
    """
    adjacency: (B, W, N, N) float32
    nodes:     (B, W, N, Fin) float32
    weights:   (W, Fin, Fout) float32
    returns:   (B, W, N, Fout) float32
    """
    B, W, N, _ = adjacency.shape
    Fin = nodes.shape[-1]
    Fout = weights.shape[-1]
    itemsize = jnp.dtype(adjacency.dtype).itemsize

    flops = 2 * B * W * (N * N * Fout + N * Fin * Fout)
    bytes_accessed = itemsize * (adjacency.size + nodes.size + weights.size
                                 + B * W * N * Fout)
    cost = pl.CostEstimate(flops=flops, transcendentals=0,
                           bytes_accessed=bytes_accessed)

    out_shape = jax.ShapeDtypeStruct((B, W, N, Fout), nodes.dtype)

    # Per-step working set of the small (per-batch-element) path, incl. double
    # buffering and the f32 intermediates.
    per_step_small = (2 * itemsize * W * (N * N + N * Fin + N * Fout)
                      + 2 * itemsize * W * Fin * Fout
                      + 2 * 4 * W * N * Fout)

    if per_step_small <= _SMALL_VMEM_BUDGET:
        # ---- Small path: grid over the batch only. -------------------------
        return pl.pallas_call(
            _gc_small_kernel,
            out_shape=out_shape,
            grid_spec=pl.GridSpec(
                grid=(B,),
                in_specs=[
                    pl.BlockSpec((pl.Squeezed(), W, N, N),
                                 lambda b: (b, 0, 0, 0)),
                    pl.BlockSpec((pl.Squeezed(), W, N, Fin),
                                 lambda b: (b, 0, 0, 0)),
                    pl.BlockSpec((W, Fin, Fout), lambda b: (0, 0, 0)),
                ],
                out_specs=pl.BlockSpec((pl.Squeezed(), W, N, Fout),
                                       lambda b: (b, 0, 0, 0)),
            ),
            compiler_params=pltpu.CompilerParams(
                dimension_semantics=("parallel",),
            ),
            cost_estimate=cost,
        )(adjacency, nodes, weights)

    # ---- Large path: row-tile the adjacency, grid = (W, row_tiles). --------
    tile_n = _choose_row_tile(B, N, Fin, Fout, itemsize, _TILED_VMEM_BUDGET)
    n_tiles = pl.cdiv(N, tile_n)

    return pl.pallas_call(
        _gc_tiled_kernel,
        out_shape=out_shape,
        grid_spec=pl.GridSpec(
            # Row tiles are the inner axis so nodes/weights of a window stay
            # resident (no re-DMA) across its row tiles.
            grid=(W, n_tiles),
            in_specs=[
                pl.BlockSpec((B, pl.Squeezed(), tile_n, N),
                             lambda w, t: (0, w, t, 0)),
                pl.BlockSpec((B, pl.Squeezed(), N, Fin),
                             lambda w, t: (0, w, 0, 0)),
                pl.BlockSpec((pl.Squeezed(), Fin, Fout),
                             lambda w, t: (w, 0, 0)),
            ],
            out_specs=pl.BlockSpec((B, pl.Squeezed(), tile_n, Fout),
                                   lambda w, t: (0, w, t, 0)),
        ),
        compiler_params=pltpu.CompilerParams(
            dimension_semantics=("parallel", "parallel"),
            vmem_limit_bytes=48 * 1024 * 1024,
        ),
        cost_estimate=cost,
    )(adjacency, nodes, weights)


# --------------------------------------------------------------------------
# Parameter init (matches torch.nn.init.xavier_uniform_ on (W, Fin, Fout))
# --------------------------------------------------------------------------
def xavier_uniform(key, shape):
    # PyTorch xavier_uniform_ on a 3-D (W, Fin, Fout) tensor:
    #   fan_in  = size(1) * receptive_field = Fin * Fout
    #   fan_out = size(0) * receptive_field = W * Fout
    W, Fin, Fout = shape
    fan_in = Fin * Fout
    fan_out = W * Fout
    bound = math.sqrt(6.0 / (fan_in + fan_out))
    return jax.random.uniform(key, shape, jnp.float32, minval=-bound, maxval=bound)


if __name__ == "__main__":
    key = jax.random.PRNGKey(0)
    k_adj, k_nodes, k_w = jax.random.split(key, 3)

    batch_size = 2
    window_size = 4
    node_num = 16
    in_features = 8
    out_features = 32

    adjacency = jax.random.uniform(
        k_adj, (batch_size, window_size, node_num, node_num), jnp.float32)
    nodes = jax.random.normal(
        k_nodes, (batch_size, window_size, node_num, in_features), jnp.float32)
    weights = xavier_uniform(k_w, (window_size, in_features, out_features))

    out = graph_convolution(adjacency, nodes, weights)
    out = jax.block_until_ready(out)

    # Pure-JAX reference check.
    ref = jnp.einsum("bwij,bwjf,wfo->bwio", adjacency, nodes, weights)
    assert out.shape == (batch_size, window_size, node_num, out_features)
    assert jnp.allclose(out, ref, atol=1e-4, rtol=1e-4)

    print("KERNEL_OK")
</pallas_src>

<mosaic_0001>
module attributes {stable_mosaic.version = 11 : i64} {
  func.func @_gc_small_kernel(%arg0: i32, %arg1: memref<1x4x16x16xf32, #tpu.memory_space<vmem>>, %arg2: memref<1x4x16x8xf32, #tpu.memory_space<vmem>>, %arg3: memref<4x8x32xf32, #tpu.memory_space<vmem>>, %arg4: memref<1x4x16x32xf32, #tpu.memory_space<vmem>>) attributes {dimension_semantics = [#tpu.dimension_semantics<parallel>], iteration_bounds = array<i64: 2>, scalar_prefetch = 0 : i64, scratch_operands = 0 : i64, tpu.core_type = #tpu.core_type<tc>, window_params = [{transform_indices = @transform_0, window_bounds = array<i64: 1, 4, 16, 16>}, {transform_indices = @transform_1, window_bounds = array<i64: 1, 4, 16, 8>}, {pipeline_mode = #tpu.pipeline_mode<synchronous>, transform_indices = @transform_2, window_bounds = array<i64: 4, 8, 32>}, {transform_indices = @transform_3, window_bounds = array<i64: 1, 4, 16, 32>}]} {
    %c0 = arith.constant 0 : index
    %c0_0 = arith.constant 0 : index
    %c0_1 = arith.constant 0 : index
    %c0_2 = arith.constant 0 : index
    %0 = vector.load %arg2[%c0, %c0_0, %c0_1, %c0_2] : memref<1x4x16x8xf32, #tpu.memory_space<vmem>>, vector<1x4x16x8xf32>
    %1 = vector.shape_cast %0 : vector<1x4x16x8xf32> to vector<4x16x8xf32>
    %c0_3 = arith.constant 0 : index
    %c0_4 = arith.constant 0 : index
    %c0_5 = arith.constant 0 : index
    %2 = vector.load %arg3[%c0_3, %c0_4, %c0_5] : memref<4x8x32xf32, #tpu.memory_space<vmem>>, vector<4x8x32xf32>
    "tpu.trace_start"() <{level = 10 : i32, message = "wnf,wfo->wno"}> : () -> ()
    %cst = arith.constant dense<0.000000e+00> : vector<4x16x32xf32>
    %3 = tpu.matmul %1, %2, %cst {dimension_numbers = #tpu.dot_dimension_numbers<[2], [1], [1], [2], [0, 0, 0, 1, 1, 2], [0], [0]>} : vector<4x16x8xf32>, vector<4x8x32xf32>, vector<4x16x32xf32> -> vector<4x16x32xf32>
    "tpu.trace_stop"() : () -> ()
    %c0_6 = arith.constant 0 : index
    %c0_7 = arith.constant 0 : index
    %c0_8 = arith.constant 0 : index
    %c0_9 = arith.constant 0 : index
    %4 = vector.load %arg1[%c0_6, %c0_7, %c0_8, %c0_9] : memref<1x4x16x16xf32, #tpu.memory_space<vmem>>, vector<1x4x16x16xf32>
    %5 = vector.shape_cast %4 : vector<1x4x16x16xf32> to vector<4x16x16xf32>
    "tpu.trace_start"() <{level = 10 : i32, message = "wij,wjo->wio"}> : () -> ()
    %cst_10 = arith.constant dense<0.000000e+00> : vector<4x16x32xf32>
    %6 = tpu.matmul %5, %3, %cst_10 {dimension_numbers = #tpu.dot_dimension_numbers<[2], [1], [1], [2], [0, 0, 0, 1, 1, 2], [0], [0]>} : vector<4x16x16xf32>, vector<4x16x32xf32>, vector<4x16x32xf32> -> vector<4x16x32xf32>
    "tpu.trace_stop"() : () -> ()
    %c0_11 = arith.constant 0 : index
    %c0_12 = arith.constant 0 : index
    %c0_13 = arith.constant 0 : index
    %c0_14 = arith.constant 0 : index
    %7 = vector.load %arg4[%c0_11, %c0_12, %c0_13, %c0_14] : memref<1x4x16x32xf32, #tpu.memory_space<vmem>>, vector<1x4x16x32xf32>
    %8 = vector.shape_cast %7 : vector<1x4x16x32xf32> to vector<4x16x32xf32>
    %9 = vector.shape_cast %6 : vector<4x16x32xf32> to vector<1x4x16x32xf32>
    tpu.vector_store %arg4[%c0_11, %c0_12, %c0_13, %c0_14], %9 {strides = array<i32>} : memref<1x4x16x32xf32, #tpu.memory_space<vmem>>, vector<1x4x16x32xf32>,
    return
  }
  func.func @transform_0(%arg0: i32) -> (i32, i32, i32, i32) {
    %c0_i32 = arith.constant 0 : i32
    %c0_i32_0 = arith.constant 0 : i32
    %c0_i32_1 = arith.constant 0 : i32
    %c0_i32_2 = arith.constant 0 : i32
    return %arg0, %c0_i32, %c0_i32_0, %c0_i32_1 : i32, i32, i32, i32
  }
  func.func @transform_1(%arg0: i32) -> (i32, i32, i32, i32) {
    %c0_i32 = arith.constant 0 : i32
    %c0_i32_0 = arith.constant 0 : i32
    %c0_i32_1 = arith.constant 0 : i32
    %c0_i32_2 = arith.constant 0 : i32
    return %arg0, %c0_i32, %c0_i32_0, %c0_i32_1 : i32, i32, i32, i32
  }
  func.func @transform_2(%arg0: i32) -> (i32, i32, i32) {
    %c0_i32 = arith.constant 0 : i32
    %c0_i32_0 = arith.constant 0 : i32
    %c0_i32_1 = arith.constant 0 : i32
    %c0_i32_2 = arith.constant 0 : i32
    return %c0_i32, %c0_i32_0, %c0_i32_1 : i32, i32, i32
  }
  func.func @transform_3(%arg0: i32) -> (i32, i32, i32, i32) {
    %c0_i32 = arith.constant 0 : i32
    %c0_i32_0 = arith.constant 0 : i32
    %c0_i32_1 = arith.constant 0 : i32
    %c0_i32_2 = arith.constant 0 : i32
    return %arg0, %c0_i32, %c0_i32_0, %c0_i32_1 : i32, i32, i32, i32
  }
}

</mosaic_0001>

<bundles_post_ra>
// kernel: tpu_custom_call.1
= control target key start
LH: loop header
LB: loop body
LE: loop exit
PB: predicated region body
PF: predicated region fallthrough
CT: control target
= control target key end

     0   :  { %8 = vsyncpa [#allocation3], 0  ;;  %s1361_s0 = inlined_call_operand.vmem [shape: f32[2,4,16,16], index: 0, kind: input, shape index: {}]   ;;  %s1362_s1 = inlined_call_operand.vmem [shape: f32[2,4,16,8], index: 1, kind: input, shape index: {}]   ;;  %s1363_s2 = inlined_call_operand.vmem [shape: f32[4,8,32], index: 2, kind: input, shape index: {}]   ;;  %s1364_s3 = inlined_call_operand.hbm [shape: f32[2,4,16,32], index: 3, kind: output, shape index: {}]  }
   0x1   :  { %10 = vsyncpa [#allocation3 + $0x1], 0  ;;  %s1209_s12 = smov 0   ;;  %s1211_s13 = smov 0  }
   0x2   :  { %s1213_s14 = smov 0   ;;  %s1215_s15 = smov 0  }
   0x3 LB: > { %s1230_s16 = sadd.s32 4294967295, %s1184_s15   ;;  %s956_s17 = sadd.s32 4294967294, %s1184_s15   ;;  %s1184_s15 = sphi %s1215_s15, %s1370_s15   ;;  %s1180_s14 = sphi %s1213_s14, %s1369_s14   ;;  %s1176_s13 = sphi %s1211_s13, %s1368_s13   ;;  %s1172_s12 = sphi %s1209_s12, %s1367_s12  }
   0x4   : > { %s1234_s18 = sadd.s32 1, %s1184_s15   ;;  %s96_s19 = sadd.s32 1, %s1180_s14 }
   0x5   : > { %s93_s20 = ssub.s32 %s1184_s15, %s1234_s18  ;;  %p106_p0 = scmp.ne.s32.totalorder %s1180_s14, %s1176_s13 }
   0x6   : > { %p94_p1 = scmp.eq.s32.totalorder %s93_s20, 0  ;;  %p107_p2 = scmp.eq.s32.totalorder %s1230_s16, 1 }
   0x7   : > { %p112_p3 = scmp.ne.s32.totalorder %s1176_s13, %s1172_s12  ;;  %p113_p4 = scmp.eq.s32.totalorder %s956_s17, 1 }
   0x8   : > { %s1245_s21 = scalar_select %p94_p1, %s1180_s14, %s96_s19  }
   0x9   : > { %p1247_p5 = por %p107_p2, %p106_p0  ;;  %p1251_p6 = por %p113_p4, %p112_p3 }
   0xa   : > { %p959_p7 = scmp.ge.s32.totalorder %s1184_s15, 1  ;;  %p150_p8 = scmp.lt.s32.totalorder %s1184_s15, 3 }
   0xc   : > { %p151_p9 = pnand %p959_p7, %p150_p8 }
   0xd   : > { %v197_v0 = vld [vmem:[%s1363_s2] sm:$0xff] (!%p151_p9)  ;;  %v198_v1 = vld [vmem:[%s1363_s2 + $0x8] sm:$0xff] (!%p151_p9)  ;;  %p179_p10 = scmp.lt.s32.totalorder (!%p151_p9), %s1230_s16, 1  ;;  %v199_v2 = vld [vmem:[%s1363_s2 + $0x10] sm:$0xff] (!%p151_p9)  ;;  %vm201_vm0 = vcmask (!%p151_p9), 64512   ;;  %vm534_vm1 = vcmask (!%p151_p9), 130048  }
   0xe   : > { %154 = sbr.rel (%p151_p9) target bundleno = 479 (0x1df), region = 32  ;;  %1017 = vmatprep.subr.mxu0 (!%p151_p9), %v197_v0  ;;  %1022 = vmatprep.subr.mxu1 (!%p151_p9), %v198_v1  ;;  %v200_v3 = vld [vmem:[%s1363_s2 + $0x18] sm:$0xff] (!%p151_p9)  ;;  %s176_s19 = sand.u32 (!%p151_p9), 1, %s1176_s13   ;;  %vm859_vm2 = vcmask (!%p151_p9), 261120  }
   0xf   : > { %1018 = vmatpush3.msra.mxu0 (!%p151_p9), %v197_v0  ;;  %1023 = vmatpush3.msra.mxu1 (!%p151_p9), %v198_v1  ;;  %s960_s20 = sshll.u32 (!%p151_p9), %s176_s19, 6  ;;  %s988_s25 = sshll.u32 (!%p151_p9), %s1230_s16, 10 }
  0x10   : > { %1027 = vmatprep.subr.mxu0 (!%p151_p9), %v199_v2  ;;  %1032 = vmatprep.subr.mxu1 (!%p151_p9), %v200_v3  ;;  %s178_s24 = scalar_lea.vmem (!%p151_p9), [#allocation2], %s960_s20  ;;  %s1312_s29 = scalar_lea.hbm (!%p151_p9), %s1364_s3, %s988_s25 }
  0x11   : > { %s882_s26 = sshll.u32 (!%p151_p9), %s178_s24, 4  ;;  %s1186_s4 = smov (!%p151_p9), [#allocation2]   ;;  %s1314_s26 = int_to_ptr.vmem [resolvable:$true] %s882_s26 }
  0x12   : > { %s1122_s30 = scalar_lea.vmem (!%p151_p9), %s1314_s26, 1024 }
  0x13   : > { %p1123_p11 = scmp.ne.s32.totalorder (!%p151_p9), %s1314_s26, %s1122_s30 }
  0x15   : > { %s180_s5 = scalar_select %p179_p10, %s1230_s16, 1 }
  0x16   : > { %s1320_s16 = scalar_lea.sflag [#allocation3], %s176_s19  ;;  %p1124_p12 = pnand %p1123_p11, %p1247_p5 }
  0x17   : > { %s986_s6 = sshll.u32 %s180_s5, 6  ;;  %s1126_s5 = sshll.u32 %s1186_s4, 4  ;;  %s1127_s5 = int_to_ptr.vmem [resolvable:$false] %s1126_s5 }
  0x18   : > { %s188_s9 = scalar_lea.vmem %s1362_s1, %s986_s6  ;;  %s1285_s17 = scalar_lea.vmem %s1361_s0, %s986_s6 }
  0x19   : > { %v189_v4 = vld [vmem:[%s188_s9] sm:$0xff]  ;;  %v191_v5 = vld [vmem:[%s188_s9 + $0x10] sm:$0xff]  ;;  %v190_v6 = vld [vmem:[%s188_s9 + $0x8] sm:$0xff]  ;;  %p1125_p13 = pneg %p1124_p12  ;;  %s1128_s6 = scalar_lea.vmem %s1127_s5, 2048 }
  0x1a   : > { %1019 = vmatprep.mubr.msk.f32.mxu0 %vm201_vm0, %v189_v4  ;;  %1024 = vmatprep.mubr.msk.f32.mxu1 %vm201_vm0, %v191_v5  ;;  %v192_v7 = vld [vmem:[%s188_s9 + $0x18] sm:$0xff]  ;;  %v193_v8 = vld [vmem:[%s188_s9 + $0x20] sm:$0xff]  ;;  %v195_v9 = vld [vmem:[%s188_s9 + $0x30] sm:$0xff]  ;;  %p1129_p0 = scmp.lt.s32.totalorder %s1314_s26, %s1127_s5  ;;  %p1130_p1 = scmp.lt.s32.totalorder %s1128_s6, %s1122_s30 }
  0x1b   : > { %1020 = vmatmul.mubr.msk.f32.vlgmr.msra.gmra.mrb[0].mxu0 %vm201_vm0, %v190_v6  ;;  %1025 = vmatmul.mubr.msk.f32.vlgmr.msra.gmra.mrb[0].mxu1 %vm201_vm0, %v192_v7  ;;  %v194_v10 = vld [vmem:[%s188_s9 + $0x28] sm:$0xff]  ;;  %v196_v11 = vld [vmem:[%s188_s9 + $0x38] sm:$0xff]  ;;  %v526_v12 = vld [vmem:[%s1285_s17] sm:$0xff] }
  0x1c   : > { %1028 = vmatpush3.msra.mxu0 %v199_v2  ;;  %1033 = vmatpush3.msra.mxu1 %v200_v3  ;;  %v528_v13 = vld [vmem:[%s1285_s17 + $0x10] sm:$0xff]  ;;  %v527_v24 = vld [vmem:[%s1285_s17 + $0x8] sm:$0xff]  ;;  %v529_v25 = vld [vmem:[%s1285_s17 + $0x18] sm:$0xff]  ;;  %p1131_p2 = por %p1130_p1, %p1129_p0 }
  0x1d   : > { %1029 = vmatprep.mubr.msk.f32.mxu0 %vm201_vm0, %v193_v8  ;;  %1034 = vmatprep.mubr.msk.f32.mxu1 %vm201_vm0, %v195_v9  ;;  %v530_v28 = vld [vmem:[%s1285_s17 + $0x20] sm:$0xff]  ;;  %v532_v29 = vld [vmem:[%s1285_s17 + $0x30] sm:$0xff]  ;;  %v531_v30 = vld [vmem:[%s1285_s17 + $0x28] sm:$0xff] }
  0x1e   : > { %v533_v31 = vld [vmem:[%s1285_s17 + $0x38] sm:$0xff]  ;;  %p1132_p3 = pnand %p1131_p2, %p1125_p13 }
  0x1f   : > { %1030 = vmatmul.mubr.msk.f32.vlgmr.msra.gmra.mrb[2].mxu0 %vm201_vm0, %v194_v10  ;;  %1035 = vmatmul.mubr.msk.f32.vlgmr.msra.gmra.mrb[2].mxu1 %vm201_vm0, %v196_v11 }
  0x20   : > { %1041 = vmatprep.mubr.msk.f32.mxu0 %vm534_vm1, %v526_v12  ;;  %1048 = vmatprep.mubr.msk.f32.mxu1 %vm534_vm1, %v528_v13 }
  0xee   : > { %v1021_v14 = vpop.f32.mrb[0].mxu0  ;;  %v1026_v15 = vpop.f32.mrb[0].mxu1 }
  0xef   : > { %v274_v16 = vpop.f32.mrb[1].mxu0  ;;  %v355_v17 = vpop.f32.mrb[1].mxu1 }
  0xf0   : > { %v1065_v18 = vpack.c.bf16 %v1021_v14, %v274_v16  ;;  %v1069_v19 = vpack.c.bf16 %v1026_v15, %v355_v17 }
  0xf2   : > { %v1031_v20 = vpop.f32.mrb[2].mxu0  ;;  %v1036_v21 = vpop.f32.mrb[2].mxu1  ;;  %1066 = vmatprep.subr.bf16.mxu0 %v1065_v18  ;;  %1070 = vmatprep.subr.bf16.mxu1 %v1069_v19 }
  0xf3   : > { %v436_v22 = vpop.f32.mrb[3].mxu0  ;;  %v517_v23 = vpop.f32.mrb[3].mxu1  ;;  %1068 = vmatpush3.bf16.msra.mxu0 %v1065_v18  ;;  %1072 = vmatpush3.bf16.msra.mxu1 %v1069_v19 }
  0xf4   : > { %v1073_v26 = vpack.c.bf16 %v1031_v20, %v436_v22  ;;  %v1077_v27 = vpack.c.bf16 %v1036_v21, %v517_v23 }
  0xf6   : > { %1042 = vmatmul.mubr.msk.f32.vlgmr.msra.gmra.mrb[4].mxu0 %vm534_vm1, %v527_v24  ;;  %1049 = vmatmul.mubr.msk.f32.vlgmr.msra.gmra.mrb[4].mxu1 %vm534_vm1, %v529_v25 }
  0xf7   : > { %1074 = vmatprep.subr.bf16.mxu0 %v1073_v26  ;;  %1078 = vmatprep.subr.bf16.mxu1 %v1077_v27 }
  0xf8   : > { %1076 = vmatpush3.bf16.msra.mxu0 %v1073_v26  ;;  %1080 = vmatpush3.bf16.msra.mxu1 %v1077_v27 }
  0xf9   : > { %1055 = vmatprep.mubr.msk.f32.mxu0 %vm534_vm1, %v530_v28  ;;  %1062 = vmatprep.mubr.msk.f32.mxu1 %vm534_vm1, %v532_v29 }
  0xfb   : > { %1056 = vmatmul.mubr.msk.f32.vlgmr.msra.gmra.mrb[6].mxu0 %vm534_vm1, %v531_v30  ;;  %1063 = vmatmul.mubr.msk.f32.vlgmr.msra.gmra.mrb[6].mxu1 %vm534_vm1, %v533_v31 }
 0x1c9   : > { %v1043_v32 = vpop.f32.mrb[4].mxu0  ;;  %v1050_v33 = vpop.f32.mrb[4].mxu1 }
 0x1ca   : > { %861 = vst.msk [vmem:[%s178_s24 + $0x8] sm:$0xff] %vm859_vm2, %v1043_v32  ;;  %863 = vst.msk [vmem:[%s178_s24 + $0x18] sm:$0xff] %vm859_vm2, %v1050_v33  ;;  %v607_v34 = vpop.f32.mrb[5].mxu0  ;;  %v688_v35 = vpop.f32.mrb[5].mxu1 }
 0x1cb   : > { %860 = vst.msk [vmem:[%s178_s24] sm:$0xff] %vm859_vm2, %v607_v34  ;;  %862 = vst.msk [vmem:[%s178_s24 + $0x10] sm:$0xff] %vm859_vm2, %v688_v35 }
 0x1ce   : > { %v1057_v36 = vpop.f32.mrb[6].mxu0  ;;  %v1064_v37 = vpop.f32.mrb[6].mxu1 }
 0x1cf   : > { %865 = vst.msk [vmem:[%s178_s24 + $0x28] sm:$0xff] %vm859_vm2, %v1057_v36  ;;  %867 = vst.msk [vmem:[%s178_s24 + $0x38] sm:$0xff] %vm859_vm2, %v1064_v37  ;;  %v769_v38 = vpop.f32.mrb[7].mxu0  ;;  %v850_v39 = vpop.f32.mrb[7].mxu1 }
 0x1d0   : > { %864 = vst.msk [vmem:[%s178_s24 + $0x20] sm:$0xff] %vm859_vm2, %v769_v38  ;;  %866 = vst.msk [vmem:[%s178_s24 + $0x30] sm:$0xff] %vm859_vm2, %v850_v39 }
 0x1d1   : > { %1135 = shalt.err (!%p1132_p3)
}
 0x1d2   : > { %s1136_s7 = scalar_lea.hbm %s1312_s29, 1024  ;;  %s1140_s10 = scalar_lea.hbm %s1364_s3, 2048 }
 0x1d3   : > { %p1137_p4 = scmp.ne.s32.totalorder %s1312_s29, %s1136_s7  ;;  %p1141_p9 = scmp.lt.u32.totalorder %s1312_s29, %s1364_s3 }
 0x1d4   : > { %p1142_p10 = scmp.lt.u32.totalorder %s1140_s10, %s1136_s7  ;;  %p1144_p12 = scmp.lt.u32.totalorder %s1136_s7, %s1312_s29 }
 0x1d5   : > { %p1138_p7 = pnand %p1137_p4, %p1247_p5 }
 0x1d6   : > { %p1143_p11 = por %p1142_p10, %p1141_p9 }
 0x1d7   : > { %p1139_p8 = pneg %p1138_p7 }
 0x1d8   : > { %p1145_p13 = por %p1144_p12, %p1143_p11 }
 0x1da   : > { %p1146_p0 = pnand %p1145_p13, %p1139_p8 }
 0x1dc   : > { %1149 = shalt.err (!%p1146_p0)
}
 0x1dd   : > { %s1187_s19 = smov 128   ;;  %s1188_s20 = smov 8  }
 0x1de   : > { %1081 = dma.vmem_to_hbm [thread:$0]  (%p1247_p5), %s1314_s26, 1024, %s1312_s29, %s1320_s16, %s1187_s19, %s1187_s19, %s1188_s20  }
 0x1df PF: > { %p1087_p1 = scmp.ge.s32.totalorder %s1184_s15, 2  ;;  %s897_s24 = sand.u32 1, %s1172_s12  }
 0x1e0   : > { %s898_s25 = scalar_lea.sflag [#allocation3], %s897_s24 }
 0x1e1   : > { %p1084_p2 = pnand %p1087_p1, %p1251_p6 }
 0x1e3   : > { %1167 = dma.done.wait (!%p1084_p2), %s898_s25, 1024  }
 0x1e4   : > { %1169 = vsyncadd (!%p1084_p2), %s898_s25, 4294966272  ;;  %p13_p3 = scmp.ge.s32.totalorder %s1234_s18, 4   ;;  %s1367_s12 = smov %s1176_s13 }
 0x1e5   : > { %s1368_s13 = smov %s1180_s14  ;;  %s1369_s14 = smov %s1245_s21 }
 0x1e6   : > { %s1370_s15 = smov %s1234_s18  ;;  %15 = sbr.rel (!%p13_p3) target bundleno = 3 (0x3), region = 70 }
 0x1ed   :  { %903 = vsyncpa [#allocation3], 1 }
 0x1ee   :  { %905 = vsyncpa [#allocation3 + $0x1], 1 }

</bundles_post_ra>
